<compile_context>
chip_gen: v5e
topology: v5e:2x2
jax: 0.10.0
libtpu: 0.0.40
codegen_flags: <defaults>
</compile_context>

<pallas_src>
import functools

import jax
import jax.numpy as jnp
from jax.experimental import pallas as pl
from jax.experimental.pallas import tpu as pltpu

IN_FEATURES = 5
OUT_FEATURES = 4
LANE = 128
TM_CAP = 131072   # 128K batch-lanes per step  (~16 MiB double-buffered VMEM)
MIN_STEPS = 4     # >= 2 grid steps per TensorCore on v7x (megacore + pipelining)


def _round_up(n, m):
    return ((n + m - 1) // m) * m


def net_kernel(w_ref, x_ref, o_ref):
    # w_ref: (4, 5)   alpha-folded weight, resident across the grid (VMEM)
    # x_ref: (5, TM)  feature-major activation tile (batch on lanes)
    # o_ref: (4, TM)  lane-dense output tile
    x = x_ref[...]
    w = w_ref[...]
    # K=5 contraction on the VPU: broadcast-multiply + add, statically unrolled.
    acc = w[:, 0:1] * x[0:1, :]
    for k in range(1, IN_FEATURES):
        acc = acc + w[:, k:k + 1] * x[k:k + 1, :]
    o_ref[...] = acc.astype(o_ref.dtype)


def _net_forward_feature_major(xt, w, alpha):
    """Core Pallas call.  xt: (5, B) feature-major activations -> (4, B) f32."""
    B = xt.shape[1]

    # Adaptive multi-MB batch tile: big enough that DMA time >> per-step overhead,
    # small enough to keep >= MIN_STEPS grid steps (v7x: 2 TCs) and fit VMEM.
    tm = min(TM_CAP, _round_up(pl.cdiv(B, MIN_STEPS), LANE))
    tm = max(tm, LANE)
    grid = (pl.cdiv(B, tm),)  # ragged last block: padded reads, masked writes

    # Fold alpha into the weight (parameter-side precompute).
    w_eff = (w * alpha[:, None]).astype(jnp.float32)  # (4, 5)

    # Double-buffered per-step VMEM ~= 128*tm bytes (5->8 / 4->8 sublane padding);
    # add slack, stay within v7x's 64 MiB physical per-TC VMEM.
    vmem_limit = int(min(64 << 20, max(16 << 20, 160 * tm + (2 << 20))))

    bytes_accessed = (IN_FEATURES + OUT_FEATURES) * 4 * B + OUT_FEATURES * IN_FEATURES * 4

    out_t = pl.pallas_call(
        net_kernel,
        out_shape=jax.ShapeDtypeStruct((OUT_FEATURES, B), jnp.float32),
        grid_spec=pltpu.PrefetchScalarGridSpec(
            num_scalar_prefetch=0,
            grid=grid,
            in_specs=[
                pl.BlockSpec((OUT_FEATURES, IN_FEATURES), lambda i: (0, 0)),  # W_eff resident
                pl.BlockSpec((IN_FEATURES, tm), lambda i: (0, i)),            # x batch tile
            ],
            out_specs=pl.BlockSpec((OUT_FEATURES, tm), lambda i: (0, i)),
        ),
        compiler_params=pltpu.CompilerParams(
            dimension_semantics=("parallel",),   # independent batch tiles -> both TCs on v7x
            vmem_limit_bytes=vmem_limit,
        ),
        cost_estimate=pl.CostEstimate(
            flops=2 * OUT_FEATURES * IN_FEATURES * B,
            transcendentals=0,
            bytes_accessed=bytes_accessed,
        ),
    )(w_eff, xt)
    return out_t


@functools.partial(jax.jit, static_argnames=("feature_major",))
def net_forward(x, w, alpha, *, feature_major=False):
    """Pallas equivalent of Net.forward: (x @ W.T) * alpha.

    feature_major=False: x is (B, 5) -> returns (B, 4)   (matches the PyTorch module).
    feature_major=True : x is (5, B) -> returns (4, B)   (no wrapper transposes; preferred
                                                          when the producer/consumer can
                                                          use feature-major layouts).
    """
    if feature_major:
        return _net_forward_feature_major(x.astype(jnp.float32), w, alpha)
    # Caller-facing (B,5)->(B,4) layout.  The two transposes are wrapper-side XLA layout
    # passes kept outside the kernel; in a real model use feature_major=True or fuse.
    xt = x.astype(jnp.float32).T                 # (5, B)
    return _net_forward_feature_major(xt, w, alpha).T


if __name__ == "__main__":
    key = jax.random.PRNGKey(0)
    k_x, k_w = jax.random.split(key)

    B = 8
    # Deterministic synthetic parameters (shapes from Net.__init__):
    #   alpha = ones(4) * 0.1
    #   op    = nn.Linear(5, 4, bias=False) -> weight (4, 5)
    alpha = jnp.ones((OUT_FEATURES,), dtype=jnp.float32) * 0.1
    bound = 1.0 / (IN_FEATURES ** 0.5)  # mimic torch Linear uniform init range
    w = jax.random.uniform(
        k_w, (OUT_FEATURES, IN_FEATURES), dtype=jnp.float32,
        minval=-bound, maxval=bound)
    x = jax.random.normal(k_x, (B, IN_FEATURES), dtype=jnp.float32)

    # Pure-JAX reference (same semantics as the PyTorch module).
    ref = (x @ w.T) * alpha[None, :]

    # 1) Module-compatible layout: (B, 5) -> (B, 4).
    out = jax.block_until_ready(net_forward(x, w, alpha))
    assert out.shape == (B, OUT_FEATURES)
    assert jnp.allclose(out, ref, atol=1e-5, rtol=1e-5)

    # 2) Feature-major fast path: (5, B) -> (4, B), no wrapper transposes.
    out_fm = jax.block_until_ready(net_forward(x.T, w, alpha, feature_major=True))
    assert out_fm.shape == (OUT_FEATURES, B)
    assert jnp.allclose(out_fm.T, ref, atol=1e-5, rtol=1e-5)

    print("KERNEL_OK")
</pallas_src>

<mosaic_0001>
module attributes {stable_mosaic.version = 11 : i64} {
  func.func @net_kernel(%arg0: i32, %arg1: memref<4x5xf32, #tpu.memory_space<vmem>>, %arg2: memref<5x128xf32, #tpu.memory_space<vmem>>, %arg3: memref<4x128xf32, #tpu.memory_space<vmem>>) attributes {dimension_semantics = [#tpu.dimension_semantics<parallel>], iteration_bounds = array<i64: 1>, scalar_prefetch = 0 : i64, scratch_operands = 0 : i64, tpu.core_type = #tpu.core_type<tc>, window_params = [{pipeline_mode = #tpu.pipeline_mode<synchronous>, transform_indices = @transform_0, window_bounds = array<i64: 4, 5>}, {transform_indices = @transform_1, window_bounds = array<i64: 5, 128>}, {transform_indices = @transform_2, window_bounds = array<i64: 4, 128>}]} {
    %c0 = arith.constant 0 : index
    %c0_0 = arith.constant 0 : index
    %0 = vector.load %arg2[%c0, %c0_0] : memref<5x128xf32, #tpu.memory_space<vmem>>, vector<5x128xf32>
    %c0_1 = arith.constant 0 : index
    %c0_2 = arith.constant 0 : index
    %1 = vector.load %arg1[%c0_1, %c0_2] : memref<4x5xf32, #tpu.memory_space<vmem>>, vector<4x5xf32>
    %2 = vector.extract_strided_slice %1 {offsets = [0, 0], sizes = [4, 1], strides = [1, 1]} : vector<4x5xf32> to vector<4x1xf32>
    %3 = vector.extract_strided_slice %0 {offsets = [0, 0], sizes = [1, 128], strides = [1, 1]} : vector<5x128xf32> to vector<1x128xf32>
    %4 = vector.broadcast %2 : vector<4x1xf32> to vector<4x128xf32>
    %5 = vector.broadcast %3 : vector<1x128xf32> to vector<4x128xf32>
    %6 = arith.mulf %4, %5 : vector<4x128xf32>
    %7 = vector.extract_strided_slice %1 {offsets = [0, 1], sizes = [4, 1], strides = [1, 1]} : vector<4x5xf32> to vector<4x1xf32>
    %8 = vector.extract_strided_slice %0 {offsets = [1, 0], sizes = [1, 128], strides = [1, 1]} : vector<5x128xf32> to vector<1x128xf32>
    %9 = vector.broadcast %7 : vector<4x1xf32> to vector<4x128xf32>
    %10 = vector.broadcast %8 : vector<1x128xf32> to vector<4x128xf32>
    %11 = arith.mulf %9, %10 : vector<4x128xf32>
    %12 = arith.addf %6, %11 : vector<4x128xf32>
    %13 = vector.extract_strided_slice %1 {offsets = [0, 2], sizes = [4, 1], strides = [1, 1]} : vector<4x5xf32> to vector<4x1xf32>
    %14 = vector.extract_strided_slice %0 {offsets = [2, 0], sizes = [1, 128], strides = [1, 1]} : vector<5x128xf32> to vector<1x128xf32>
    %15 = vector.broadcast %13 : vector<4x1xf32> to vector<4x128xf32>
    %16 = vector.broadcast %14 : vector<1x128xf32> to vector<4x128xf32>
    %17 = arith.mulf %15, %16 : vector<4x128xf32>
    %18 = arith.addf %12, %17 : vector<4x128xf32>
    %19 = vector.extract_strided_slice %1 {offsets = [0, 3], sizes = [4, 1], strides = [1, 1]} : vector<4x5xf32> to vector<4x1xf32>
    %20 = vector.extract_strided_slice %0 {offsets = [3, 0], sizes = [1, 128], strides = [1, 1]} : vector<5x128xf32> to vector<1x128xf32>
    %21 = vector.broadcast %19 : vector<4x1xf32> to vector<4x128xf32>
    %22 = vector.broadcast %20 : vector<1x128xf32> to vector<4x128xf32>
    %23 = arith.mulf %21, %22 : vector<4x128xf32>
    %24 = arith.addf %18, %23 : vector<4x128xf32>
    %25 = vector.extract_strided_slice %1 {offsets = [0, 4], sizes = [4, 1], strides = [1, 1]} : vector<4x5xf32> to vector<4x1xf32>
    %26 = vector.extract_strided_slice %0 {offsets = [4, 0], sizes = [1, 128], strides = [1, 1]} : vector<5x128xf32> to vector<1x128xf32>
    %27 = vector.broadcast %25 : vector<4x1xf32> to vector<4x128xf32>
    %28 = vector.broadcast %26 : vector<1x128xf32> to vector<4x128xf32>
    %29 = arith.mulf %27, %28 : vector<4x128xf32>
    %30 = arith.addf %24, %29 : vector<4x128xf32>
    %c0_3 = arith.constant 0 : index
    %c0_4 = arith.constant 0 : index
    %31 = vector.load %arg3[%c0_3, %c0_4] : memref<4x128xf32, #tpu.memory_space<vmem>>, vector<4x128xf32>
    tpu.vector_store %arg3[%c0_3, %c0_4], %30 {strides = array<i32>} : memref<4x128xf32, #tpu.memory_space<vmem>>, vector<4x128xf32>,
    return
  }
  func.func @transform_0(%arg0: i32) -> (i32, i32) {
    %c0_i32 = arith.constant 0 : i32
    %c0_i32_0 = arith.constant 0 : i32
    %c0_i32_1 = arith.constant 0 : i32
    return %c0_i32, %c0_i32_0 : i32, i32
  }
  func.func @transform_1(%arg0: i32) -> (i32, i32) {
    %c0_i32 = arith.constant 0 : i32
    %c0_i32_0 = arith.constant 0 : i32
    return %c0_i32, %arg0 : i32, i32
  }
  func.func @transform_2(%arg0: i32) -> (i32, i32) {
    %c0_i32 = arith.constant 0 : i32
    %c0_i32_0 = arith.constant 0 : i32
    return %c0_i32, %arg0 : i32, i32
  }
}

</mosaic_0001>

<bundles_post_ra>
// kernel: net_forward.1
= control target key start
LH: loop header
LB: loop body
LE: loop exit
PB: predicated region body
PF: predicated region fallthrough
CT: control target
= control target key end

     0   :  { %v104_v1 = vmov 0   ;;  %v105_v2 = vmov 2   ;;  %s134_s0 = inlined_call_operand.vmem [shape: f32[4,5], index: 0, kind: input, shape index: {}]   ;;  %s135_s1 = inlined_call_operand.vmem [shape: f32[5,8], index: 1, kind: input, shape index: {}]   ;;  %s136_s2 = inlined_call_operand.hbm [shape: f32[4,8], index: 2, kind: output, shape index: {}]  }
   0x1   :  { %v13_v0 = vld [vmem:[%s134_s0] sm:$0xf]  ;;  %72 = vset.pattern.permute.xlu0 %v104_v1  ;;  %74 = vset.pattern.permute.xlu1 %v105_v2 }
   0x2   :  { %7 = vsyncpa [#allocation3], 0  ;;  %16 = vperm.xlu0 %72, %v13_v0   ;;  %29 = vperm.xlu1 %74, %v13_v0   ;;  %v106_v3 = vmov 4   ;;  %v107_v4 = vmov 1   ;;  %v108_v5 = vmov 3   ;;  %s109_s12 = smov [#allocation2]  }
   0x3   :  { %76 = vset.pattern.permute.xlu2 %v106_v3  ;;  %v12_v8 = vld [vmem:[%s135_s1] sm:$0x1f]  ;;  %s55_s13 = sshll.u32 %s109_s12, 4  ;;  %s57_s1 = sshll.u32 %s136_s2, 4  ;;  %s56_s13 = int_to_ptr.vmem [resolvable:$true] %s55_s13  ;;  %s58_s1 = int_to_ptr.hbm [resolvable:$true] %s57_s1 }
   0x4   :  { %43 = vperm.xlu2 %76, %v13_v0   ;;  %v19_v9 = vperm.slane %v12_v8, 0  ;;  %v25_v10 = vperm.slane %v12_v8, 1  ;;  %v32_v11 = vperm.slane %v12_v8, 2  ;;  %v39_v12 = vperm.slane %v12_v8, 3 }
   0x5   :  { %v46_v17 = vperm.slane %v12_v8, 4 }
   0xa   :  { %73 = vset.pattern.permute.xlu0 %v107_v4  ;;  %75 = vset.pattern.permute.xlu1 %v108_v5 }
   0xb   :  { %22 = vperm.xlu0 %73, %v13_v0   ;;  %36 = vperm.xlu1 %75, %v13_v0  }
  0x13   :  { %77 = vset.pattern.permute.xlu0 %v106_v3 }
  0x5e   :  { %v44_v18 = vpop.permute.xlu2 %43 }
  0x5f   :  { %v47_v23 = vmul.f32 %v46_v17, %v44_v18 }
  0x74   :  { %v17_v6 = vpop.permute.xlu0 %16  ;;  %v30_v7 = vpop.permute.xlu1 %29 }
  0x75   :  { %v20_v15 = vmul.f32 %v19_v9, %v17_v6  ;;  %v33_v19 = vmul.f32 %v32_v11, %v30_v7 }
  0x7d   :  { %v23_v13 = vpop.permute.xlu0 %22  ;;  %v37_v14 = vpop.permute.xlu1 %36 }
  0x7e   :  { %v26_v16 = vmul.f32 %v25_v10, %v23_v13  ;;  %v40_v21 = vmul.f32 %v39_v12, %v37_v14 }
  0x80   :  { %v27_v20 = vadd.f32 %v26_v16, %v20_v15 }
  0x82   :  { %v34_v22 = vadd.f32 %v33_v19, %v27_v20 }
  0x84   :  { %v41_v24 = vadd.f32 %v40_v21, %v34_v22 }
  0x86   :  { %v48_v25 = vadd.f32 %v47_v23, %v41_v24 }
  0x88   :  { %49 = vst [vmem:[#allocation2] sm:$0xf] %v48_v25 }
  0x89   :  { %60 = dma.vmem_to_hbm [thread:$0]  %s56_s13, 64, %s58_s1, [#allocation3]  }
  0x8a   :  { %102 = dma.done.wait [#allocation3], 64  }
  0x8b   :  { %103 = vsyncadd [#allocation3], 4294967232 }
  0x8c   :  { %65 = vsyncpa [#allocation3], 1 }

</bundles_post_ra>
